<compile_context>
chip_gen: v7x
topology: tpu7x:2x2x1
jax: 0.10.0
libtpu: 0.0.40
codegen_flags: <defaults>
</compile_context>

<pallas_src>
import jax
import jax.numpy as jnp
from jax.experimental import pallas as pl
from jax.experimental.pallas import tpu as pltpu


def _senet_kernel(x_ref, w1t_ref, w2t_ref, o_ref):
    # x_ref:   (TM, C_pad)
    # w1t_ref: (C_pad, H_pad)   pre-transposed squeeze weight
    # w2t_ref: (H_pad, C_pad)   pre-transposed excitation weight
    x = x_ref[...]

    # squeeze: (TM, C) @ (C, H) -> (TM, H), f32 accumulation on the MXU
    h = jnp.dot(x, w1t_ref[...], preferred_element_type=jnp.float32)
    h = jnp.maximum(h, 0.0)

    # excitation: (TM, H) @ (H, C) -> (TM, C)
    g = jnp.dot(h.astype(w2t_ref.dtype), w2t_ref[...],
                preferred_element_type=jnp.float32)
    g = jax.nn.sigmoid(g)

    # gate the input in its native dtype
    o_ref[...] = (x * g.astype(x.dtype)).astype(o_ref.dtype)


def _round_up(a, b):
    return ((a + b - 1) // b) * b


def senet_forward(x, w1, w2, *, tm_max=512):
    """x: (..., C); w1: (C//r, C); w2: (C, C//r). Returns same shape as x."""
    orig_shape = x.shape
    C = orig_shape[-1]
    H = w1.shape[0]
    x2d = x.reshape(-1, C)
    M = x2d.shape[0]

    # Lane-dense padding of the channel dims (multiples of 128).
    C_pad = _round_up(max(C, 128), 128)
    H_pad = _round_up(max(H, 128), 128)

    # Row tile: up to tm_max rows, multiple of 8; pad M to a multiple of TM.
    TM = min(tm_max, _round_up(M, 8))
    M_pad = _round_up(M, TM)

    # Zero-padded operands (padding is semantics-preserving, see header).
    x_p = jnp.zeros((M_pad, C_pad), dtype=x.dtype).at[:M, :C].set(x2d)
    w1t = jnp.zeros((C_pad, H_pad), dtype=w1.dtype).at[:C, :H].set(
        jnp.transpose(w1))
    w2t = jnp.zeros((H_pad, C_pad), dtype=w2.dtype).at[:H, :C].set(
        jnp.transpose(w2))

    itemsize = jnp.dtype(x.dtype).itemsize
    cost = pl.CostEstimate(
        flops=4 * M_pad * C_pad * H_pad,
        transcendentals=M_pad * C_pad,           # sigmoid exp
        bytes_accessed=(2 * M_pad * C_pad + 2 * C_pad * H_pad) * itemsize,
    )

    out = pl.pallas_call(
        _senet_kernel,
        out_shape=jax.ShapeDtypeStruct((M_pad, C_pad), x.dtype),
        grid_spec=pl.GridSpec(
            grid=(M_pad // TM,),
            in_specs=[
                pl.BlockSpec((TM, C_pad), lambda i: (i, 0)),     # x tile
                pl.BlockSpec((C_pad, H_pad), lambda i: (0, 0)),  # w1t resident
                pl.BlockSpec((H_pad, C_pad), lambda i: (0, 0)),  # w2t resident
            ],
            out_specs=pl.BlockSpec((TM, C_pad), lambda i: (i, 0)),
        ),
        compiler_params=pltpu.CompilerParams(
            dimension_semantics=("parallel",)),
        cost_estimate=cost,
    )(x_p, w1t, w2t)

    return out[:M, :C].reshape(orig_shape)


def senet_reference(x, w1, w2):
    gates = jnp.maximum(x @ w1.T, 0.0)
    gates = jax.nn.sigmoid(gates @ w2.T)
    return x * gates


if __name__ == "__main__":
    key = jax.random.PRNGKey(0)
    kx, k1, k2 = jax.random.split(key, 3)

    batch, seq, channels, ratio = 2, 8, 32, 8
    hidden = channels // ratio

    x = jax.random.normal(kx, (batch, seq, channels), dtype=jnp.float32)
    # PyTorch Linear weight shapes: (out_features, in_features).
    w1 = jax.random.normal(k1, (hidden, channels), dtype=jnp.float32) * 0.1
    w2 = jax.random.normal(k2, (channels, hidden), dtype=jnp.float32) * 0.1

    out = senet_forward(x, w1, w2)
    out = jax.block_until_ready(out)

    ref = senet_reference(x, w1, w2)
    assert out.shape == x.shape
    assert jnp.allclose(out, ref, atol=1e-5, rtol=1e-5), "mismatch vs reference"

    print("KERNEL_OK")
</pallas_src>

<mosaic_0001>
module attributes {stable_mosaic.version = 11 : i64} {
  func.func @_senet_kernel(%arg0: i32, %arg1: memref<16x128xf32, #tpu.memory_space<vmem>>, %arg2: memref<128x128xf32, #tpu.memory_space<vmem>>, %arg3: memref<128x128xf32, #tpu.memory_space<vmem>>, %arg4: memref<16x128xf32, #tpu.memory_space<vmem>>) attributes {dimension_semantics = [#tpu.dimension_semantics<parallel>], iteration_bounds = array<i64: 1>, scalar_prefetch = 0 : i64, scratch_operands = 0 : i64, tpu.core_type = #tpu.core_type<tc>, window_params = [{transform_indices = @transform_0, window_bounds = array<i64: 16, 128>}, {pipeline_mode = #tpu.pipeline_mode<synchronous>, transform_indices = @transform_1, window_bounds = array<i64: 128, 128>}, {pipeline_mode = #tpu.pipeline_mode<synchronous>, transform_indices = @transform_2, window_bounds = array<i64: 128, 128>}, {transform_indices = @transform_3, window_bounds = array<i64: 16, 128>}]} {
    %c0 = arith.constant 0 : index
    %c0_0 = arith.constant 0 : index
    %0 = vector.load %arg1[%c0, %c0_0] : memref<16x128xf32, #tpu.memory_space<vmem>>, vector<16x128xf32>
    %c0_1 = arith.constant 0 : index
    %c0_2 = arith.constant 0 : index
    %1 = vector.load %arg2[%c0_1, %c0_2] : memref<128x128xf32, #tpu.memory_space<vmem>>, vector<128x128xf32>
    %cst = arith.constant dense<0.000000e+00> : vector<16x128xf32>
    %2 = tpu.matmul %0, %1, %cst {dimension_numbers = #tpu.dot_dimension_numbers<[1], [0], [0], [1], [0, 0, 1, 1], [], []>} : vector<16x128xf32>, vector<128x128xf32>, vector<16x128xf32> -> vector<16x128xf32>
    %cst_3 = arith.constant 0.000000e+00 : f32
    %3 = vector.broadcast %cst_3 : f32 to vector<16x128xf32>
    %4 = arith.maximumf %2, %3 : vector<16x128xf32>
    %c0_4 = arith.constant 0 : index
    %c0_5 = arith.constant 0 : index
    %5 = vector.load %arg3[%c0_4, %c0_5] : memref<128x128xf32, #tpu.memory_space<vmem>>, vector<128x128xf32>
    %cst_6 = arith.constant dense<0.000000e+00> : vector<16x128xf32>
    %6 = tpu.matmul %4, %5, %cst_6 {dimension_numbers = #tpu.dot_dimension_numbers<[1], [0], [0], [1], [0, 0, 1, 1], [], []>} : vector<16x128xf32>, vector<128x128xf32>, vector<16x128xf32> -> vector<16x128xf32>
    %7 = arith.negf %6 : vector<16x128xf32>
    %8 = math.exp %7 : vector<16x128xf32>
    %cst_7 = arith.constant 1.000000e+00 : f32
    %9 = vector.broadcast %cst_7 : f32 to vector<16x128xf32>
    %10 = arith.addf %9, %8 : vector<16x128xf32>
    %11 = arith.divf %9, %10 : vector<16x128xf32>
    %12 = arith.mulf %0, %11 : vector<16x128xf32>
    %c0_8 = arith.constant 0 : index
    %c0_9 = arith.constant 0 : index
    %13 = vector.load %arg4[%c0_8, %c0_9] : memref<16x128xf32, #tpu.memory_space<vmem>>, vector<16x128xf32>
    tpu.vector_store %arg4[%c0_8, %c0_9], %12 {strides = array<i32>} : memref<16x128xf32, #tpu.memory_space<vmem>>, vector<16x128xf32>,
    return
  }
  func.func @transform_0(%arg0: i32) -> (i32, i32) {
    %c0_i32 = arith.constant 0 : i32
    %c0_i32_0 = arith.constant 0 : i32
    return %arg0, %c0_i32 : i32, i32
  }
  func.func @transform_1(%arg0: i32) -> (i32, i32) {
    %c0_i32 = arith.constant 0 : i32
    %c0_i32_0 = arith.constant 0 : i32
    %c0_i32_1 = arith.constant 0 : i32
    return %c0_i32, %c0_i32_0 : i32, i32
  }
  func.func @transform_2(%arg0: i32) -> (i32, i32) {
    %c0_i32 = arith.constant 0 : i32
    %c0_i32_0 = arith.constant 0 : i32
    %c0_i32_1 = arith.constant 0 : i32
    return %c0_i32, %c0_i32_0 : i32, i32
  }
  func.func @transform_3(%arg0: i32) -> (i32, i32) {
    %c0_i32 = arith.constant 0 : i32
    %c0_i32_0 = arith.constant 0 : i32
    return %arg0, %c0_i32 : i32, i32
  }
}

</mosaic_0001>

<bundles_post_ra>
// kernel: tpu_custom_call.1
= control target key start
LH: loop header
LB: loop body
LE: loop exit
PB: predicated region body
PF: predicated region fallthrough
CT: control target
= control target key end

     0   :  { %8 = vsyncpa [#allocation3], 0  ;;  %s653_s0 = inlined_call_operand.hbm [shape: f32[16,128], index: 0, kind: input, shape index: {}]   ;;  %s654_s1 = inlined_call_operand.hbm [shape: f32[128,128], index: 1, kind: input, shape index: {}]   ;;  %s655_s2 = inlined_call_operand.hbm [shape: f32[128,128], index: 2, kind: input, shape index: {}]   ;;  %s656_s3 = inlined_call_operand.hbm [shape: f32[16,128], index: 3, kind: output, shape index: {}]  }
   0x1   :  { %9 = vsyncpa [#allocation6], 0 }
   0x2   :  { %10 = vsyncpa [#allocation4], 0  ;;  %s556_s12 = smov [#allocation5]   ;;  %s557_s14 = smov [#allocation2]  }
   0x3   :  { %s28_s13 = sshll.u32 %s556_s12, 4  ;;  %s16_s15 = sshll.u32 %s557_s14, 4  ;;  %s29_s13 = int_to_ptr.vmem [resolvable:$true] %s28_s13  ;;  %s582_s15 = int_to_ptr.vmem [resolvable:$true] %s16_s15 }
   0x4   :  { %s462_s18 = scalar_lea.hbm %s654_s1, 2048 }
   0x5   :  { %p463_p0 = scmp.ne.s32.totalorder %s654_s1, %s462_s18  ;;  %p466_p1 = scmp.lt.u32.totalorder %s462_s18, %s654_s1 }
   0x7   :  { %p468_p2 = pnand %p466_p1, %p463_p0 }
   0x9   :  { %471 = shalt.err (!%p468_p2)
}
   0xa   :  { %s472_s23 = scalar_lea.vmem %s29_s13, 2048  ;;  %p477_p4 = scmp.lt.s32.totalorder %s29_s13, %s29_s13 }
   0xb   :  { %p473_p3 = scmp.ne.s32.totalorder %s29_s13, %s472_s23  ;;  %p478_p5 = scmp.lt.s32.totalorder %s472_s23, %s472_s23 }
   0xd   :  { %p479_p6 = por %p478_p5, %p477_p4 }
   0xf   :  { %p480_p7 = pnand %p479_p6, %p473_p3 }
  0x11   :  { %483 = shalt.err (!%p480_p7)
}
  0x12   :  { %s558_s24 = smov 128   ;;  %s559_s25 = smov 8  }
  0x13   :  { %34 = dma.hbm_to_vmem [thread:$0]  %s654_s1, 2048, %s29_s13, [#allocation6], %s558_s24, %s558_s24, %s559_s25  }
  0x14   :  { %s484_s30 = scalar_lea.hbm %s653_s0, 256 }
  0x15   :  { %p485_p8 = scmp.ne.s32.totalorder %s653_s0, %s484_s30  ;;  %p488_p9 = scmp.lt.u32.totalorder %s484_s30, %s653_s0 }
  0x17   :  { %p490_p10 = pnand %p488_p9, %p485_p8 }
  0x19   :  { %493 = shalt.err (!%p490_p10)
}
  0x1a   :  { %s494_s8 = scalar_lea.vmem %s582_s15, 256  ;;  %p499_p12 = scmp.lt.s32.totalorder %s582_s15, %s582_s15 }
  0x1b   :  { %p495_p11 = scmp.ne.s32.totalorder %s582_s15, %s494_s8  ;;  %p500_p13 = scmp.lt.s32.totalorder %s494_s8, %s494_s8 }
  0x1d   :  { %p501_p0 = por %p500_p13, %p499_p12 }
  0x1f   :  { %p502_p1 = pnand %p501_p0, %p495_p11 }
  0x21   :  { %505 = shalt.err (!%p502_p1)
}
  0x22   :  { %22 = dma.hbm_to_vmem [thread:$0]  %s653_s0, 256, %s582_s15, [#allocation3], %s558_s24, %s558_s24, %s559_s25  }
  0x23   :  { %s560_s10 = smov [#allocation7]   ;;  %s506_s14 = scalar_lea.hbm %s655_s2, 2048 }
  0x24   :  { %s40_s11 = sshll.u32 %s560_s10, 4  ;;  %p507_p2 = scmp.ne.s32.totalorder %s655_s2, %s506_s14  ;;  %s41_s11 = int_to_ptr.vmem [resolvable:$true] %s40_s11 }
  0x25   :  { %p510_p3 = scmp.lt.u32.totalorder %s506_s14, %s655_s2 }
  0x27   :  { %p512_p4 = pnand %p510_p3, %p507_p2 }
  0x29   :  { %515 = shalt.err (!%p512_p4)
}
  0x2a   :  { %s516_s20 = scalar_lea.vmem %s41_s11, 2048  ;;  %p521_p6 = scmp.lt.s32.totalorder %s41_s11, %s41_s11 }
  0x2b   :  { %p517_p5 = scmp.ne.s32.totalorder %s41_s11, %s516_s20  ;;  %p522_p7 = scmp.lt.s32.totalorder %s516_s20, %s516_s20 }
  0x2d   :  { %p523_p8 = por %p522_p7, %p521_p6 }
  0x2f   :  { %p524_p9 = pnand %p523_p8, %p517_p5 }
  0x31   :  { %527 = shalt.err (!%p524_p9)
}
  0x32   :  { %46 = dma.hbm_to_vmem [thread:$0]  %s655_s2, 2048, %s41_s11, [#allocation6], %s558_s24, %s558_s24, %s559_s25  }
  0x33   :  { %550 = dma.done.wait [#allocation3], 256  }
  0x34   :  { %551 = vsyncadd [#allocation3], 4294967040 }
  0x35   :  { %552 = dma.done.wait [#allocation6], 4096  }
  0x36   :  { %553 = vsyncadd [#allocation6], 4294963200  ;;  %v58_v0 = vld [vmem:[#allocation5] sm:$0xff]  ;;  %v59_v1 = vld [vmem:[#allocation5 + $0x8] sm:$0xff]  ;;  %s561_s2 = smov [#allocation8]  }
  0x37   :  { %v60_v2 = vld [vmem:[#allocation5 + $0x10] sm:$0xff]  ;;  %v384_v3 = vpack.c.bf16 %v59_v1, %v58_v0  ;;  %v61_v4 = vld [vmem:[#allocation5 + $0x18] sm:$0xff]  ;;  %v62_v6 = vld [vmem:[#allocation5 + $0x20] sm:$0xff]  ;;  %s263_s21 = sshll.u32 %s561_s2, 4  ;;  %s264_s21 = int_to_ptr.vmem [resolvable:$true] %s263_s21 }
  0x38   :  { %v388_v5 = vpack.c.bf16 %v61_v4, %v60_v2  ;;  %v63_v7 = vld [vmem:[#allocation5 + $0x28] sm:$0xff]  ;;  %v64_v9 = vld [vmem:[#allocation5 + $0x30] sm:$0xff]  ;;  %v65_v10 = vld [vmem:[#allocation5 + $0x38] sm:$0xff]  ;;  %s528_s22 = scalar_lea.vmem %s264_s21, 256  ;;  %p533_p11 = scmp.lt.s32.totalorder %s264_s21, %s264_s21 }
  0x39   :  { %385 = vmatprep.subr.bf16.mxu0 %v384_v3  ;;  %v392_v8 = vpack.c.bf16 %v63_v7, %v62_v6  ;;  %v634_v11 = vld [vmem:[#allocation2] sm:$0xff]  ;;  %v151_v12 = vld [vmem:[#allocation7] sm:$0xff]  ;;  %v152_v13 = vld [vmem:[#allocation7 + $0x8] sm:$0xff]  ;;  %v396_v20 = vpack.c.bf16 %v65_v10, %v64_v9  ;;  %p529_p10 = scmp.ne.s32.totalorder %s264_s21, %s528_s22  ;;  %p534_p12 = scmp.lt.s32.totalorder %s528_s22, %s528_s22 }
  0x3a   :  { %387 = vmatpush3.bf16.msra.mxu0 %v384_v3  ;;  %346 = vmatprep.mubr.f32.mxu0 %v634_v11  ;;  %v153_v14 = vld [vmem:[#allocation7 + $0x10] sm:$0xff]  ;;  %v416_v15 = vpack.c.bf16 %v152_v13, %v151_v12  ;;  %v154_v16 = vld [vmem:[#allocation7 + $0x18] sm:$0xff]  ;;  %v155_v18 = vld [vmem:[#allocation7 + $0x20] sm:$0xff] }
  0x3b   :  { %389 = vmatprep.subr.bf16.mxu0 %v388_v5  ;;  %v420_v17 = vpack.c.bf16 %v154_v16, %v153_v14  ;;  %v156_v19 = vld [vmem:[#allocation7 + $0x28] sm:$0xff]  ;;  %v66_v21 = vld [vmem:[#allocation5 + $0x40] sm:$0xff]  ;;  %v157_v24 = vld [vmem:[#allocation7 + $0x30] sm:$0xff]  ;;  %p535_p13 = por %p534_p12, %p533_p11 }
  0x3c   :  { %417 = vmatprep.subr.bf16.mxu1 %v416_v15  ;;  %v67_v22 = vld [vmem:[#allocation5 + $0x48] sm:$0xff]  ;;  %v424_v23 = vpack.c.bf16 %v156_v19, %v155_v18  ;;  %v158_v25 = vld [vmem:[#allocation7 + $0x38] sm:$0xff]  ;;  %v68_v27 = vld [vmem:[#allocation5 + $0x50] sm:$0xff] }
  0x3d   :  { %419 = vmatpush3.bf16.msra.mxu1 %v416_v15  ;;  %v400_v26 = vpack.c.bf16 %v67_v22, %v66_v21  ;;  %v69_v28 = vld [vmem:[#allocation5 + $0x58] sm:$0xff]  ;;  %v428_v29 = vpack.c.bf16 %v158_v25, %v157_v24  ;;  %v159_v30 = vld [vmem:[#allocation7 + $0x40] sm:$0xff]  ;;  %v160_v31 = vld [vmem:[#allocation7 + $0x48] sm:$0xff]  ;;  %p536_p0 = pnand %p535_p13, %p529_p10 }
  0x3e   :  { %391 = vmatpush3.bf16.msra.mxu0 %v388_v5  ;;  %421 = vmatprep.subr.bf16.mxu1 %v420_v17  ;;  %v404_v32 = vpack.c.bf16 %v69_v28, %v68_v27  ;;  %v70_v33 = vld [vmem:[#allocation5 + $0x60] sm:$0xff]  ;;  %v71_v34 = vld [vmem:[#allocation5 + $0x68] sm:$0xff]  ;;  %v432_v35 = vpack.c.bf16 %v160_v31, %v159_v30  ;;  %v161_v36 = vld [vmem:[#allocation7 + $0x50] sm:$0xff] }
  0x3f   :  { %393 = vmatprep.subr.bf16.mxu0 %v392_v8  ;;  %v162_v37 = vld [vmem:[#allocation7 + $0x58] sm:$0xff]  ;;  %v408_v38 = vpack.c.bf16 %v71_v34, %v70_v33  ;;  %v72_v39 = vld [vmem:[#allocation5 + $0x70] sm:$0xff]  ;;  %v163_v42 = vld [vmem:[#allocation7 + $0x60] sm:$0xff] }
  0x40   :  { %v73_v40 = vld [vmem:[#allocation5 + $0x78] sm:$0xff]  ;;  %v436_v41 = vpack.c.bf16 %v162_v37, %v161_v36  ;;  %v164_v43 = vld [vmem:[#allocation7 + $0x68] sm:$0xff]  ;;  %v165_v47 = vld [vmem:[#allocation7 + $0x70] sm:$0xff] }
  0x41   :  { %423 = vmatpush3.bf16.msra.mxu1 %v420_v17  ;;  %v412_v44 = vpack.c.bf16 %v73_v40, %v72_v39  ;;  %v440_v45 = vpack.c.bf16 %v164_v43, %v163_v42  ;;  %v57_v46 = vld [vmem:[#allocation2 + $0x8] sm:$0xff] }
  0x42   :  { %395 = vmatpush3.bf16.msra.mxu0 %v392_v8  ;;  %425 = vmatprep.subr.bf16.mxu1 %v424_v23  ;;  %v166_v48 = vld [vmem:[#allocation7 + $0x78] sm:$0xff] }
  0x43   :  { %397 = vmatprep.subr.bf16.mxu0 %v396_v20  ;;  %v444_v49 = vpack.c.bf16 %v166_v48, %v165_v47 }
  0x45   :  { %427 = vmatpush3.bf16.msra.mxu1 %v424_v23 }
  0x46   :  { %399 = vmatpush3.bf16.msra.mxu0 %v396_v20  ;;  %429 = vmatprep.subr.bf16.mxu1 %v428_v29 }
  0x47   :  { %401 = vmatprep.subr.bf16.mxu0 %v400_v26 }
  0x49   :  { %431 = vmatpush3.bf16.msra.mxu1 %v428_v29 }
  0x4a   :  { %403 = vmatpush3.bf16.msra.mxu0 %v400_v26  ;;  %433 = vmatprep.subr.bf16.mxu1 %v432_v35 }
  0x4b   :  { %405 = vmatprep.subr.bf16.mxu0 %v404_v32 }
  0x4d   :  { %435 = vmatpush3.bf16.msra.mxu1 %v432_v35 }
  0x4e   :  { %407 = vmatpush3.bf16.msra.mxu0 %v404_v32  ;;  %437 = vmatprep.subr.bf16.mxu1 %v436_v41 }
  0x4f   :  { %409 = vmatprep.subr.bf16.mxu0 %v408_v38 }
  0x51   :  { %439 = vmatpush3.bf16.msra.mxu1 %v436_v41 }
  0x52   :  { %411 = vmatpush3.bf16.msra.mxu0 %v408_v38  ;;  %441 = vmatprep.subr.bf16.mxu1 %v440_v45 }
  0x53   :  { %413 = vmatprep.subr.bf16.mxu0 %v412_v44 }
  0x55   :  { %443 = vmatpush3.bf16.msra.mxu1 %v440_v45 }
  0x56   :  { %415 = vmatpush3.bf16.msra.mxu0 %v412_v44  ;;  %445 = vmatprep.subr.bf16.mxu1 %v444_v49 }
  0x59   :  { %347 = vmatmul.mubr.f32.vlgmr.msra.gmra.mrb[0].mxu0 %v57_v46  ;;  %447 = vmatpush3.bf16.msra.mxu1 %v444_v49 }
 0x12c   :  { %v348_v50 = vpop.f32.mrb[0].mxu0 }
 0x12d   :  { %v140_v51 = vpop.f32.mrb[1].mxu0  ;;  %v150_v53 = vmax.f32 %v348_v50, 0.0 }
 0x12e   :  { %v149_v52 = vmax.f32 %v140_v51, 0.0 }
 0x130   :  { %381 = vmatprep.mubr.f32.mxu1 %v149_v52 }
 0x131   :  { %382 = vmatmul.mubr.f32.vlgmr.msra.gmra.mrb[0].mxu1 %v150_v53 }
 0x204   :  { %v383_v54 = vpop.f32.mrb[0].mxu1 }
 0x205   :  { %v277_v55 = vmul.f32 -1.442695, %v383_v54  ;;  %v233_v56 = vpop.f32.mrb[1].mxu1 }
 0x206   :  { %v276_v57 = vmul.f32 -1.442695, %v233_v56 }
 0x207   :  { %454 = vpow2.f32 %v277_v55 }
 0x208   :  { %456 = vpow2.f32 %v276_v57 }
 0x211   :  { %v455_v58 = vpop.eup %454 }
 0x212   :  { %v457_v59 = vpop.eup %456  ;;  %v249_v60 = vadd.f32 1.0, %v455_v58 }
 0x213   :  { %v248_v61 = vadd.f32 1.0, %v457_v59 }
 0x214   :  { %458 = vrcp.f32 %v249_v60 }
 0x215   :  { %460 = vrcp.f32 %v248_v61 }
 0x21e   :  { %v459_v62 = vpop.eup %458 }
 0x21f   :  { %v461_v63 = vpop.eup %460  ;;  %v255_v0 = vmul.f32 %v459_v62, %v57_v46 }
 0x220   :  { %v254_v1 = vmul.f32 %v461_v63, %v634_v11 }
 0x221   :  { %257 = vst [vmem:[#allocation8 + $0x8] sm:$0xff] %v255_v0 }
 0x222   :  { %256 = vst [vmem:[#allocation8] sm:$0xff] %v254_v1 }
 0x223   :  { %539 = shalt.err (!%p536_p0)
}
 0x224   :  { %s540_s27 = scalar_lea.hbm %s656_s3, 256 }
 0x225   :  { %p541_p1 = scmp.ne.s32.totalorder %s656_s3, %s540_s27  ;;  %p544_p2 = scmp.lt.u32.totalorder %s540_s27, %s656_s3 }
 0x227   :  { %p546_p3 = pnand %p544_p2, %p541_p1 }
 0x229   :  { %549 = shalt.err (!%p546_p3)
}
 0x22a   :  { %269 = dma.vmem_to_hbm [thread:$0]  %s264_s21, 256, %s656_s3, [#allocation4], %s558_s24, %s558_s24, %s559_s25  }
 0x22b   :  { %554 = dma.done.wait [#allocation4], 256  }
 0x22c   :  { %555 = vsyncadd [#allocation4], 4294967040 }
 0x22d   :  { %273 = vsyncpa [#allocation3], 1 }
 0x22e   :  { %274 = vsyncpa [#allocation6], 1 }
 0x22f   :  { %275 = vsyncpa [#allocation4], 1 }

</bundles_post_ra>
